<compile_context>
chip_gen: v5e
topology: v5e:2x2
jax: 0.10.0
libtpu: 0.0.40
codegen_flags: <defaults>
</compile_context>

<pallas_src>
import math

import jax
import jax.numpy as jnp
from jax import lax
from jax.experimental import pallas as pl
from jax.experimental.pallas import tpu as pltpu

# ---- small synthetic config (exercises row + vocab tiling and padding) ----
BATCH = 2
SEQ = 9            # N = 18 rows -> padded to 32 with row_tile=16 (2 row tiles)
HIDDEN = 32
VOCAB = 1000       # not a multiple of 128 -> exercises vocab padding path
LN_EPS = 1e-12
_INV_SQRT2 = 1.0 / math.sqrt(2.0)


def _round_up(x, m):
    return (x + m - 1) // m * m


def _gelu(x):
    # exact erf-based gelu (transformers' `gelu`, config.hidden_act default)
    return 0.5 * x * (1.0 + lax.erf(x * _INV_SQRT2))


def _layer_norm(x, gamma, beta):
    mu = jnp.mean(x, axis=-1, keepdims=True)
    var = jnp.mean((x - mu) ** 2, axis=-1, keepdims=True)
    return (x - mu) * lax.rsqrt(var + LN_EPS) * gamma + beta


def lm_head_kernel(x_ref, wd_ref, bd_ref, g_ref, b_ref,
                   wdec_ref, bdec_ref, out_ref, h_scr):
    # --- BertPredictionHeadTransform: dense -> GELU -> LayerNorm ---
    # Computed once per row tile (first vocab tile, which is the innermost /
    # sequential grid axis) and cached in VMEM scratch; every subsequent vocab
    # tile of this row tile reuses it.
    @pl.when(pl.program_id(1) == 0)
    def _():
        x = x_ref[...].astype(jnp.float32)
        h = jnp.dot(x, wd_ref[...], preferred_element_type=jnp.float32) + bd_ref[...]
        h = _gelu(h)
        h = _layer_norm(h, g_ref[...], b_ref[...])
        h_scr[...] = h.astype(h_scr.dtype)          # bf16 cache for decoder matmul

    # --- decoder: Linear(hidden -> vocab) + shared bias, f32 accumulation ---
    logits = jnp.dot(h_scr[...], wdec_ref[...],
                     preferred_element_type=jnp.float32) + bdec_ref[...]
    out_ref[...] = logits.astype(out_ref.dtype)


def bert_lm_prediction_head(hidden_states, params, *,
                            row_tile=256, vocab_tile=1024,
                            decoder_dtype=jnp.bfloat16,
                            logits_dtype=None):
    """BertLMPredictionHead.forward: (B, S, H) -> (B, S, V)."""
    B, S, H = hidden_states.shape
    V = params['w_dec'].shape[1]
    N = B * S
    if logits_dtype is None:
        logits_dtype = hidden_states.dtype   # set to jnp.bfloat16 if the loss allows

    # --- tile sizing: keep (8, 128) alignment, clamp for small problems ---
    row_tile = _round_up(max(8, min(row_tile, _round_up(N, 8))), 8)
    vocab_tile = _round_up(max(128, min(vocab_tile, _round_up(V, 128))), 128)

    N_pad = _round_up(N, row_tile)
    V_pad = _round_up(V, vocab_tile)
    n_row_tiles = N_pad // row_tile
    n_vocab_tiles = V_pad // vocab_tile

    # --- flatten + pad rows (zeros are harmless: LN(const row) is finite) ---
    x2d = hidden_states.reshape(N, H).astype(jnp.float32)
    if N_pad != N:
        x2d = jnp.pad(x2d, ((0, N_pad - N), (0, 0)))

    # --- decoder weights in bf16 (halves the dominant HBM stream), padded V ---
    w_dec = params['w_dec'].astype(decoder_dtype)
    b_dec = params['b_dec'].astype(jnp.float32)
    if V_pad != V:
        w_dec = jnp.pad(w_dec, ((0, 0), (0, V_pad - V)))
        b_dec = jnp.pad(b_dec, ((0, 0), (0, V_pad - V)))

    w_dense = params['w_dense'].astype(jnp.float32)
    b_dense = params['b_dense'].astype(jnp.float32)
    ln_g = params['ln_g'].astype(jnp.float32)
    ln_b = params['ln_b'].astype(jnp.float32)

    # --- VMEM budget (double-buffered inputs/outputs + scratch), cap 64 MiB (v7x) ---
    dec_sz = jnp.dtype(decoder_dtype).itemsize
    out_sz = jnp.dtype(logits_dtype).itemsize
    vmem_needed = (
        2 * row_tile * H * 4                 # x tiles (f32)
        + 2 * (H * H * 4 + 3 * H * 4)        # w_dense + biases + LN params
        + 2 * H * vocab_tile * dec_sz        # w_dec tiles
        + 2 * vocab_tile * 4                 # b_dec tiles
        + 2 * row_tile * vocab_tile * out_sz # output tiles
        + row_tile * H * dec_sz              # h_scr scratch
    )
    vmem_limit = int(min(max(int(vmem_needed * 1.5) + (4 << 20), 32 << 20), 64 << 20))

    # --- advisory cost estimate for XLA scheduling ---
    cost = pl.CostEstimate(
        flops=int(2 * N_pad * H * H + 2 * N_pad * H * V_pad),
        transcendentals=int(N_pad * H),
        bytes_accessed=int(N_pad * H * 4 + H * H * 4
                           + n_row_tiles * H * V_pad * dec_sz   # W_dec re-streamed per row tile
                           + N_pad * V_pad * out_sz),
    )

    in_specs = [
        pl.BlockSpec((row_tile, H), lambda i, j: (i, 0)),      # x rows
        pl.BlockSpec((H, H), lambda i, j: (0, 0)),             # transform.dense W (in, out)
        pl.BlockSpec((1, H), lambda i, j: (0, 0)),             # transform.dense b
        pl.BlockSpec((1, H), lambda i, j: (0, 0)),             # LayerNorm gamma
        pl.BlockSpec((1, H), lambda i, j: (0, 0)),             # LayerNorm beta
        # NOTE(v7x): if profiling shows exposed W_dec DMA, add
        # pipeline_mode=pl.Buffered(3) to this spec (and the out spec).
        pl.BlockSpec((H, vocab_tile), lambda i, j: (0, j)),    # decoder W, tiled over vocab
        pl.BlockSpec((1, vocab_tile), lambda i, j: (0, j)),    # decoder bias, tiled over vocab
    ]
    out_spec = pl.BlockSpec((row_tile, vocab_tile), lambda i, j: (i, j))

    out2d = pl.pallas_call(
        lm_head_kernel,
        out_shape=jax.ShapeDtypeStruct((N_pad, V_pad), logits_dtype),
        grid_spec=pltpu.PrefetchScalarGridSpec(
            num_scalar_prefetch=0,
            # rows outer ("parallel" -> megacore sharding on v7x),
            # vocab inner ("arbitrary" -> sequential; required for h_scr reuse).
            grid=(n_row_tiles, n_vocab_tiles),
            in_specs=in_specs,
            out_specs=out_spec,
            scratch_shapes=[pltpu.VMEM((row_tile, H), decoder_dtype)],
        ),
        compiler_params=pltpu.CompilerParams(
            dimension_semantics=("parallel", "arbitrary"),
            vmem_limit_bytes=vmem_limit),
        cost_estimate=cost,
    )(x2d, w_dense, b_dense, ln_g, ln_b, w_dec, b_dec)

    return out2d[:N, :V].reshape(B, S, V)


# ---------------- pure-JAX reference for validation ----------------
def bert_lm_prediction_head_ref(hidden_states, params):
    h = hidden_states @ params['w_dense'] + params['b_dense']
    h = _gelu(h)
    h = _layer_norm(h, params['ln_g'], params['ln_b'])
    return h @ params['w_dec'] + params['b_dec']


if __name__ == "__main__":
    key = jax.random.PRNGKey(0)
    k_x, k_wd, k_bd, k_g, k_b, k_wdec, k_bdec = jax.random.split(key, 7)

    hidden_states = jax.random.normal(k_x, (BATCH, SEQ, HIDDEN), jnp.float32)

    std = 0.02
    params = {
        # nn.Linear weights stored transposed as (in_features, out_features)
        'w_dense': jax.random.normal(k_wd, (HIDDEN, HIDDEN), jnp.float32) * std,
        'b_dense': jax.random.normal(k_bd, (1, HIDDEN), jnp.float32) * std,
        'ln_g': 1.0 + jax.random.normal(k_g, (1, HIDDEN), jnp.float32) * 0.1,
        'ln_b': jax.random.normal(k_b, (1, HIDDEN), jnp.float32) * 0.1,
        'w_dec': jax.random.normal(k_wdec, (HIDDEN, VOCAB), jnp.float32) * std,
        # decoder.bias is the shared `self.bias` parameter (zeros in torch init;
        # random here so the bias-add path is actually exercised)
        'b_dec': jax.random.normal(k_bdec, (1, VOCAB), jnp.float32) * std,
    }

    ref = bert_lm_prediction_head_ref(hidden_states, params)

    # Full-precision decoder path: tight check against the f32 reference.
    # (row_tile=16 / vocab_tile=512 exercise row tiling, vocab tiling, and
    #  padding: N=18 -> 32 padded rows, V=1000 -> 1024 padded vocab.)
    out_f32 = bert_lm_prediction_head(hidden_states, params,
                                      row_tile=16, vocab_tile=512,
                                      decoder_dtype=jnp.float32)
    out_f32 = jax.block_until_ready(out_f32)
    assert out_f32.shape == (BATCH, SEQ, VOCAB)
    assert jnp.allclose(out_f32, ref, atol=1e-4, rtol=1e-4), "f32 path mismatch"

    # Default (production) path: bf16 decoder operands, f32 accumulation.
    out = bert_lm_prediction_head(hidden_states, params,
                                  row_tile=16, vocab_tile=512)
    out = jax.block_until_ready(out)
    assert out.shape == (BATCH, SEQ, VOCAB)
    assert jnp.allclose(out, ref, atol=1e-2, rtol=1e-2), "bf16 path mismatch"

    print("KERNEL_OK")
</pallas_src>

<mosaic_0001>
module attributes {stable_mosaic.version = 11 : i64} {
  func.func @lm_head_kernel(%arg0: i32, %arg1: i32, %arg2: memref<16x32xf32, #tpu.memory_space<vmem>>, %arg3: memref<32x32xf32, #tpu.memory_space<vmem>>, %arg4: memref<1x32xf32, #tpu.memory_space<vmem>>, %arg5: memref<1x32xf32, #tpu.memory_space<vmem>>, %arg6: memref<1x32xf32, #tpu.memory_space<vmem>>, %arg7: memref<32x512xf32, #tpu.memory_space<vmem>>, %arg8: memref<1x512xf32, #tpu.memory_space<vmem>>, %arg9: memref<16x512xf32, #tpu.memory_space<vmem>>, %arg10: memref<16x32xf32, #tpu.memory_space<vmem>>) attributes {dimension_semantics = [#tpu.dimension_semantics<parallel>, #tpu.dimension_semantics<arbitrary>], iteration_bounds = array<i64: 2, 2>, scalar_prefetch = 0 : i64, scratch_operands = 1 : i64, tpu.core_type = #tpu.core_type<tc>, window_params = [{transform_indices = @transform_0, window_bounds = array<i64: 16, 32>}, {pipeline_mode = #tpu.pipeline_mode<synchronous>, transform_indices = @transform_1, window_bounds = array<i64: 32, 32>}, {pipeline_mode = #tpu.pipeline_mode<synchronous>, transform_indices = @transform_2, window_bounds = array<i64: 1, 32>}, {pipeline_mode = #tpu.pipeline_mode<synchronous>, transform_indices = @transform_3, window_bounds = array<i64: 1, 32>}, {pipeline_mode = #tpu.pipeline_mode<synchronous>, transform_indices = @transform_4, window_bounds = array<i64: 1, 32>}, {transform_indices = @transform_5, window_bounds = array<i64: 32, 512>}, {transform_indices = @transform_6, window_bounds = array<i64: 1, 512>}, {transform_indices = @transform_7, window_bounds = array<i64: 16, 512>}]} {
    %c0_i32 = arith.constant 0 : i32
    %0 = arith.cmpi eq, %arg1, %c0_i32 : i32
    %1 = arith.extui %0 : i1 to i32
    %c0_i32_0 = arith.constant 0 : i32
    %2 = arith.cmpi ne, %1, %c0_i32_0 : i32
    scf.if %2 {
      %c0_8 = arith.constant 0 : index
      %c0_9 = arith.constant 0 : index
      %10 = vector.load %arg2[%c0_8, %c0_9] : memref<16x32xf32, #tpu.memory_space<vmem>>, vector<16x32xf32>
      %c0_10 = arith.constant 0 : index
      %c0_11 = arith.constant 0 : index
      %11 = vector.load %arg3[%c0_10, %c0_11] : memref<32x32xf32, #tpu.memory_space<vmem>>, vector<32x32xf32>
      %cst_12 = arith.constant dense<0.000000e+00> : vector<16x32xf32>
      %12 = tpu.matmul %10, %11, %cst_12 {dimension_numbers = #tpu.dot_dimension_numbers<[1], [0], [0], [1], [0, 0, 1, 1], [], []>} : vector<16x32xf32>, vector<32x32xf32>, vector<16x32xf32> -> vector<16x32xf32>
      %c0_13 = arith.constant 0 : index
      %c0_14 = arith.constant 0 : index
      %13 = vector.load %arg4[%c0_13, %c0_14] : memref<1x32xf32, #tpu.memory_space<vmem>>, vector<1x32xf32>
      %14 = vector.broadcast %13 : vector<1x32xf32> to vector<16x32xf32>
      %15 = arith.addf %12, %14 : vector<16x32xf32>
      %cst_15 = arith.constant 5.000000e-01 : f32
      %16 = vector.broadcast %cst_15 : f32 to vector<16x32xf32>
      %17 = arith.mulf %16, %15 : vector<16x32xf32>
      %cst_16 = arith.constant 0.707106769 : f32
      %18 = vector.broadcast %cst_16 : f32 to vector<16x32xf32>
      %19 = arith.mulf %15, %18 : vector<16x32xf32>
      %20 = math.erf %19 : vector<16x32xf32>
      %cst_17 = arith.constant 1.000000e+00 : f32
      %21 = vector.broadcast %cst_17 : f32 to vector<16x32xf32>
      %22 = arith.addf %21, %20 : vector<16x32xf32>
      %23 = arith.mulf %17, %22 : vector<16x32xf32>
      %c0_18 = arith.constant 0 : index
      %c0_19 = arith.constant 0 : index
      %24 = vector.load %arg5[%c0_18, %c0_19] : memref<1x32xf32, #tpu.memory_space<vmem>>, vector<1x32xf32>
      %c0_20 = arith.constant 0 : index
      %c0_21 = arith.constant 0 : index
      %25 = vector.load %arg6[%c0_20, %c0_21] : memref<1x32xf32, #tpu.memory_space<vmem>>, vector<1x32xf32>
      %cst_22 = arith.constant dense<0.000000e+00> : vector<16xf32>
      %26 = vector.multi_reduction <add>, %23, %cst_22 [1] : vector<16x32xf32> to vector<16xf32>
      %27 = vector.shape_cast %26 : vector<16xf32> to vector<16x1xf32>
      %cst_23 = arith.constant 3.200000e+01 : f32
      %28 = vector.broadcast %cst_23 : f32 to vector<16x1xf32>
      %29 = arith.divf %27, %28 : vector<16x1xf32>
      %30 = vector.broadcast %29 : vector<16x1xf32> to vector<16x32xf32>
      %31 = arith.subf %23, %30 : vector<16x32xf32>
      %32 = arith.mulf %31, %31 : vector<16x32xf32>
      %cst_24 = arith.constant dense<0.000000e+00> : vector<16xf32>
      %33 = vector.multi_reduction <add>, %32, %cst_24 [1] : vector<16x32xf32> to vector<16xf32>
      %34 = vector.shape_cast %33 : vector<16xf32> to vector<16x1xf32>
      %cst_25 = arith.constant 3.200000e+01 : f32
      %35 = vector.broadcast %cst_25 : f32 to vector<16x1xf32>
      %36 = arith.divf %34, %35 : vector<16x1xf32>
      %37 = vector.broadcast %29 : vector<16x1xf32> to vector<16x32xf32>
      %38 = arith.subf %23, %37 : vector<16x32xf32>
      %cst_26 = arith.constant 9.99999996E-13 : f32
      %39 = vector.broadcast %cst_26 : f32 to vector<16x1xf32>
      %40 = arith.addf %36, %39 : vector<16x1xf32>
      %41 = math.rsqrt %40 : vector<16x1xf32>
      %42 = vector.broadcast %41 : vector<16x1xf32> to vector<16x32xf32>
      %43 = arith.mulf %38, %42 : vector<16x32xf32>
      %44 = vector.broadcast %24 : vector<1x32xf32> to vector<16x32xf32>
      %45 = arith.mulf %43, %44 : vector<16x32xf32>
      %46 = vector.broadcast %25 : vector<1x32xf32> to vector<16x32xf32>
      %47 = arith.addf %45, %46 : vector<16x32xf32>
      %c0_27 = arith.constant 0 : index
      %c0_28 = arith.constant 0 : index
      %48 = vector.load %arg10[%c0_27, %c0_28] : memref<16x32xf32, #tpu.memory_space<vmem>>, vector<16x32xf32>
      tpu.vector_store %arg10[%c0_27, %c0_28], %47 {strides = array<i32>} : memref<16x32xf32, #tpu.memory_space<vmem>>, vector<16x32xf32>,
    } else {
    }
    %c0 = arith.constant 0 : index
    %c0_1 = arith.constant 0 : index
    %3 = vector.load %arg10[%c0, %c0_1] : memref<16x32xf32, #tpu.memory_space<vmem>>, vector<16x32xf32>
    %c0_2 = arith.constant 0 : index
    %c0_3 = arith.constant 0 : index
    %4 = vector.load %arg7[%c0_2, %c0_3] : memref<32x512xf32, #tpu.memory_space<vmem>>, vector<32x512xf32>
    %cst = arith.constant dense<0.000000e+00> : vector<16x512xf32>
    %5 = tpu.matmul %3, %4, %cst {dimension_numbers = #tpu.dot_dimension_numbers<[1], [0], [0], [1], [0, 0, 1, 1], [], []>} : vector<16x32xf32>, vector<32x512xf32>, vector<16x512xf32> -> vector<16x512xf32>
    %c0_4 = arith.constant 0 : index
    %c0_5 = arith.constant 0 : index
    %6 = vector.load %arg8[%c0_4, %c0_5] : memref<1x512xf32, #tpu.memory_space<vmem>>, vector<1x512xf32>
    %7 = vector.broadcast %6 : vector<1x512xf32> to vector<16x512xf32>
    %8 = arith.addf %5, %7 : vector<16x512xf32>
    %c0_6 = arith.constant 0 : index
    %c0_7 = arith.constant 0 : index
    %9 = vector.load %arg9[%c0_6, %c0_7] : memref<16x512xf32, #tpu.memory_space<vmem>>, vector<16x512xf32>
    tpu.vector_store %arg9[%c0_6, %c0_7], %8 {strides = array<i32>} : memref<16x512xf32, #tpu.memory_space<vmem>>, vector<16x512xf32>,
    return
  }
  func.func @transform_0(%arg0: i32, %arg1: i32) -> (i32, i32) {
    %c0_i32 = arith.constant 0 : i32
    %c0_i32_0 = arith.constant 0 : i32
    return %arg0, %c0_i32 : i32, i32
  }
  func.func @transform_1(%arg0: i32, %arg1: i32) -> (i32, i32) {
    %c0_i32 = arith.constant 0 : i32
    %c0_i32_0 = arith.constant 0 : i32
    %c0_i32_1 = arith.constant 0 : i32
    return %c0_i32, %c0_i32_0 : i32, i32
  }
  func.func @transform_2(%arg0: i32, %arg1: i32) -> (i32, i32) {
    %c0_i32 = arith.constant 0 : i32
    %c0_i32_0 = arith.constant 0 : i32
    %c0_i32_1 = arith.constant 0 : i32
    return %c0_i32, %c0_i32_0 : i32, i32
  }
  func.func @transform_3(%arg0: i32, %arg1: i32) -> (i32, i32) {
    %c0_i32 = arith.constant 0 : i32
    %c0_i32_0 = arith.constant 0 : i32
    %c0_i32_1 = arith.constant 0 : i32
    return %c0_i32, %c0_i32_0 : i32, i32
  }
  func.func @transform_4(%arg0: i32, %arg1: i32) -> (i32, i32) {
    %c0_i32 = arith.constant 0 : i32
    %c0_i32_0 = arith.constant 0 : i32
    %c0_i32_1 = arith.constant 0 : i32
    return %c0_i32, %c0_i32_0 : i32, i32
  }
  func.func @transform_5(%arg0: i32, %arg1: i32) -> (i32, i32) {
    %c0_i32 = arith.constant 0 : i32
    %c0_i32_0 = arith.constant 0 : i32
    return %c0_i32, %arg1 : i32, i32
  }
  func.func @transform_6(%arg0: i32, %arg1: i32) -> (i32, i32) {
    %c0_i32 = arith.constant 0 : i32
    %c0_i32_0 = arith.constant 0 : i32
    return %c0_i32, %arg1 : i32, i32
  }
  func.func @transform_7(%arg0: i32, %arg1: i32) -> (i32, i32) {
    %c0_i32 = arith.constant 0 : i32
    return %arg0, %arg1 : i32, i32
  }
}

</mosaic_0001>

<bundles_post_ra>
// kernel: tpu_custom_call.1
= control target key start
LH: loop header
LB: loop body
LE: loop exit
PB: predicated region body
PF: predicated region fallthrough
CT: control target
= control target key end

     0   :  { %s1816_s0 = inlined_call_operand.hbm [shape: f32[32,32], index: 0, kind: input, shape index: {}]   ;;  %s1817_s1 = inlined_call_operand.hbm [shape: f32[32,32], index: 1, kind: input, shape index: {}]   ;;  %s1818_s2 = inlined_call_operand.vmem [shape: f32[1,32], index: 2, kind: input, shape index: {}]   ;;  %s1819_s3 = inlined_call_operand.vmem [shape: f32[1,32], index: 3, kind: input, shape index: {}]   ;;  %s1820_s4 = inlined_call_operand.vmem [shape: f32[1,32], index: 4, kind: input, shape index: {}]   ;;  %s1821_s5 = inlined_call_operand.hbm [shape: f32[32,1024], index: 5, kind: input, shape index: {}]   ;;  %s1822_s6 = inlined_call_operand.hbm [shape: f32[1,1024], index: 6, kind: input, shape index: {}]   ;;  %s1823_s7 = inlined_call_operand.hbm [shape: f32[32,1024], index: 7, kind: output, shape index: {}]  }
   0x1   :  { %1832 = sst [smem:[#allocation24_spill]] %s1816_s0 }
   0x2   :  { %1833 = sst [smem:[#allocation25_spill]] %s1817_s1 }
   0x3   :  { %1834 = sst [smem:[#allocation26_spill]] %s1818_s2 }
   0x4   :  { %1835 = sst [smem:[#allocation27_spill]] %s1819_s3 }
   0x5   :  { %1836 = sst [smem:[#allocation28_spill]] %s1820_s4 }
   0x6   :  { %1837 = sst [smem:[#allocation29_spill]] %s1821_s5 }
   0x7   :  { %1838 = sst [smem:[#allocation30_spill]] %s1823_s7 }
   0x8   :  { %12 = vsyncpa [#allocation4], 0 }
   0x9   :  { %14 = vsyncpa [#allocation4 + $0x1], 0 }
   0xa   :  { %15 = vsyncpa [#allocation7], 0 }
   0xb   :  { %16 = vsyncpa [#allocation5], 0 }
   0xc   :  { %18 = vsyncpa [#allocation5 + $0x1], 0  ;;  %s1439_s24 = smov 0   ;;  %s1441_s25 = smov 0  }
   0xd   :  { %s1443_s26 = smov 0   ;;  %s1445_s27 = smov 0  }
   0xe   :  { %s1447_s28 = smov 0   ;;  %s1449_s29 = smov 0  }
   0xf   :  { %s1451_s30 = smov 0   ;;  %s1453_s8 = smov 0  }
  0x10   :  { %s1455_s9 = smov 0   ;;  %s1457_s10 = smov 0  }
  0x11   :  { %s1459_s11 = smov 0   ;;  %s1461_s12 = smov 0  }
  0x12   :  { %s1463_s13 = smov 0   ;;  %s1465_s14 = smov 0  }
  0x13 LB: > { %1839 = sst [smem:[#allocation15_spill]] %s1343_s26  ;;  %s33_s15 = sadd.s32 1, %s1379_s12  ;;  %s1387_s14 = sphi %s1465_s14, %s24_s14   ;;  %s1383_s13 = sphi %s1463_s13, %s1887_s13   ;;  %s1379_s12 = sphi %s1461_s12, %s1886_s12   ;;  %s1375_s11 = sphi %s1459_s11, %s1872_s11   ;;  %s1371_s10 = sphi %s1457_s10, %s1885_s10   ;;  %s1367_s9 = sphi %s1455_s9, %s1884_s9   ;;  %s1363_s8 = sphi %s1453_s8, %s1883_s8   ;;  %s1359_s30 = sphi %s1451_s30, %s1882_s30   ;;  %s1355_s29 = sphi %s1449_s29, %s1881_s29   ;;  %s1351_s28 = sphi %s1447_s28, %s1880_s28   ;;  %s1347_s27 = sphi %s1445_s27, %s1879_s27   ;;  %s1343_s26 = sphi %s1443_s26, %s1878_s26   ;;  %s1339_s25 = sphi %s1441_s25, %s1877_s25   ;;  %s1335_s24 = sphi %s1439_s24, %s1876_s24  }
  0x14   : > { %1840 = sst [smem:[#allocation16_spill]] %s1367_s9  ;;  %s36_s16 = sadd.s32 1, %s1383_s13 }
  0x15   : > { %1841 = sst [smem:[#allocation17_spill]] %s1375_s11  ;;  %p34_p0 = scmp.ge.s32.totalorder %s33_s15, 2 }
  0x16   : > { %1842 = sst [smem:[#allocation18_spill]] %s1383_s13  ;;  %s43_s17 = sadd.s32 1, %s1367_s9 }
  0x17   : > { %p50_p1 = scmp.ne.s32.totalorder %s1367_s9, %s1363_s8  ;;  %p51_p2 = scmp.eq.s32.totalorder %s1387_s14, 0 }
  0x18   : > { %s1889_s15 = smov (%p34_p0, %s33_s15), 0  ;;  %s1891_s16 = smov (!%p34_p0, %s36_s16), %s1383_s13 }
  0x19   : > { %1843 = sst [smem:[#allocation19_spill]] %s1889_s15  ;;  %p1520_p3 = por %p51_p2, %p50_p1 }
  0x1a   : > { %p56_p4 = scmp.ne.s32.totalorder %s1363_s8, %s1359_s30  ;;  %p38_p5 = scmp.ge.s32.totalorder %s1891_s16, 2 }
  0x1b   : > { %s1528_s19 = ssub.s32 %s1379_s12, %s1889_s15  ;;  %s207_s20 = sadd.s32 1, %s1343_s26 }
  0x1c   : > { %p151_p6 = scmp.eq.s32.totalorder %s1528_s19, 0  ;;  %s1893_s16 = smov (%p38_p5, %s1891_s16), 0 }
  0x1d   : > { %1845 = sst [smem:[#allocation20_spill]] %s1893_s16  ;;  %s40_s21 = ssub.s32 %s1383_s13, %s1893_s16 }
  0x1e   : > { %p41_p7 = scmp.eq.s32.totalorder %s40_s21, 0  ;;  %s204_s22 = sor.u32 %s1528_s19, %s40_s21 }
  0x1f   : > { %p205_p8 = scmp.eq.s32.totalorder %s204_s22, 0  ;;  %p975_p9 = scmp.lt.s32.totalorder %s1387_s14, 4 }
  0x20   : > { %s1539_s23 = scalar_select %p41_p7, %s1367_s9, %s43_s17  }
  0x21   : > { %s1542_s7 = scalar_select %p205_p8, %s1343_s26, %s207_s20  }
  0x22   : > { %1846 = sst [smem:[#allocation21_spill]] %s1539_s23  ;;  %s267_s15 = sand.u32 1, %s1387_s14  }
  0x23   : > { %1847 = sst [smem:[#allocation22_spill]] %s1542_s7  ;;  %s269_s11 = sand.u32 1, %s1367_s9  }
  0x24   : > { %s903_s4 = sshll.u32 %s269_s11, 4  ;;  %s937_s16 = sshll.u32 %s1383_s13, 4 }
  0x25   : > { %s1848_s0 = sld [smem:[#allocation24_spill]]  ;;  %s271_s17 = scalar_lea.vmem [#allocation3], %s903_s4 }
  0x26   : > { %s279_s20 = sshll.u32 %s271_s17, 4  ;;  %p961_p10 = pnand %p975_p9, %p1520_p3  ;;  %s280_s20 = int_to_ptr.vmem [resolvable:$true] %s279_s20 }
  0x27   : > { %s1554_s23 = scalar_lea.sflag [#allocation4], %s267_s15  ;;  %s1828_s11 = smov 128  }
  0x28   : > { %s1829_s13 = smov 8   ;;  %s153_s2 = sadd.s32 1, %s1355_s29 }
  0x29   : > { %s1564_s3 = scalar_select %p151_p6, %s1355_s29, %s153_s2  }
  0x2a   : > { %p160_p11 = scmp.ne.s32.totalorder %s1355_s29, %s1351_s28  ;;  %s291_s4 = sand.u32 1, %s1355_s29  }
  0x2b   : > { %s276_s21 = scalar_lea.hbm %s1848_s0, %s937_s16  ;;  %1849 = sst [smem:[#allocation23_spill]] %s1564_s3 }
  0x2c   : > { %s277_s22 = sshll.u32 %s276_s21, 4  ;;  %s906_s15 = sshll.u32 %s291_s4, 7  ;;  %s278_s22 = int_to_ptr.hbm [resolvable:$true] %s277_s22 }
  0x2d   : > { %963 = dma.hbm_to_vmem [thread:$0]  (!%p961_p10), %s278_s22, 256, %s280_s20, %s1554_s23, %s1828_s11, %s1828_s11, %s1829_s13  }
  0x2e   : > { %s938_s16 = sshll.u32 %s1379_s12, 5  ;;  %p162_p12 = por %p160_p11, %p51_p2 }
  0x2f   : > { %s1850_s5 = sld [smem:[#allocation29_spill]]  ;;  %s293_s17 = scalar_lea.vmem [#allocation8], %s906_s15 }
  0x30   : > { %s301_s20 = sshll.u32 %s293_s17, 4  ;;  %p1579_p13 = pnand %p975_p9, %p162_p12  ;;  %s302_s20 = int_to_ptr.vmem [resolvable:$true] %s301_s20 }
  0x31   : > { %s1391_s18 = smov 1024   ;;  %s1392_s21 = smov 512  }
  0x32   : > { %s1587_s15 = sadd.s32 4294967295, %s1387_s14   ;;  %p166_p1 = scmp.ne.s32.totalorder %s1351_s28, %s1347_s27 }
  0x33   : > { %p57_p0 = scmp.eq.s32.totalorder %s1587_s15, 0  ;;  %p217_p2 = scmp.ne.s32.totalorder %s1343_s26, %s1339_s25 }
  0x34   : > { %p218_p3 = scmp.eq.s32.totalorder %s1587_s15, 3  ;;  %p223_p8 = scmp.ne.s32.totalorder %s1339_s25, %s1335_s24 }
  0x35   : > { %s298_s19 = scalar_lea.hbm %s1850_s5, %s938_s16  ;;  %s1393_s16 = smov 32  }
  0x36   : > { %s299_s22 = sshll.u32 %s298_s19, 4  ;;  %s899_s19 = sadd.s32 4294967294, %s1387_s14   ;;  %s300_s22 = int_to_ptr.hbm [resolvable:$true] %s299_s22 }
  0x37   : > { %966 = dma.hbm_to_vmem [thread:$0]  (!%p1579_p13), %s300_s22, 2048, %s302_s20, %s1554_s23, %s1391_s18, %s1392_s21, %s1393_s16  }
  0x38   : > { %p1601_p5 = por %p57_p0, %p56_p4  ;;  %p1607_p6 = por %p166_p1, %p57_p0 }
  0x39   : > { %p1611_p7 = por %p218_p3, %p217_p2  ;;  %p224_p9 = scmp.eq.s32.totalorder %s899_s19, 3 }
  0x3a   : > { %p900_p10 = scmp.ge.s32.totalorder %s1387_s14, 1  ;;  %p231_p11 = scmp.lt.s32.totalorder %s1387_s14, 5 }
  0x3b   : > { %p1619_p12 = por %p224_p9, %p223_p8  ;;  %s1856_s1 = sld [smem:[#allocation25_spill]] }
  0x3c   : > { %p1626_p4 = pnand %p900_p10, %p231_p11  ;;  %s909_s19 = sshll.u32 %s291_s4, 2 }
  0x3d   : > { %s1394_s11 = smov [#allocation6]   ;;  %s910_s0 = sshll.u32 %s1379_s12, 2 }
  0x3e   : > { %p956_p1 = pneg %p1626_p4  ;;  %s244_s13 = sshll.u32 %s1394_s11, 4  ;;  %s245_s13 = int_to_ptr.vmem [resolvable:$true] %s244_s13 }
  0x3f   : > { %s315_s5 = scalar_lea.vmem [#allocation9], %s909_s19  ;;  %s1858_s7 = smov 8  }
  0x40   : > { %p957_p2 = pnand %p956_p1, %p57_p0  ;;  %s323_s9 = sshll.u32 %s315_s5, 4  ;;  %s324_s9 = int_to_ptr.vmem [resolvable:$true] %s323_s9 }
  0x41   : > { %s242_s21 = sshll.u32 %s1856_s1, 4  ;;  %s319_s1 = scalar_lea.hbm %s1822_s6, %s910_s0  ;;  %s243_s21 = int_to_ptr.hbm [resolvable:$true] %s242_s21 }
  0x42   : > { %s321_s3 = sshll.u32 %s319_s1, 4  ;;  %s1859_s26 = smov 128   ;;  %s322_s3 = int_to_ptr.hbm [resolvable:$true] %s321_s3 }
  0x43   : > { %959 = dma.hbm_to_vmem [thread:$0]  (!%p957_p2), %s243_s21, 512, %s245_s13, [#allocation7], %s1859_s26, %s1859_s26, %s1858_s7  }
  0x44   : > { %969 = dma.hbm_to_vmem [thread:$0]  (!%p1579_p13), %s322_s3, 64, %s324_s9, %s1554_s23  }
  0x45   : > { %332 = sbr.rel (%p1626_p4) target bundleno = 710 (0x2c6), region = 48  ;;  %s334_s11 = sand.u32 (!%p1626_p4), 1, %s1587_s15  }
  0x46   : > { %s336_s4 = sand.u32 (!%p1626_p4), 1, %s1363_s8   ;;  %s335_s1 = scalar_lea.sflag (!%p1626_p4), [#allocation4], %s334_s11 }
  0x47   : > { %s1650_s0 = sshll.u32 (!%p1626_p4), %s336_s4, 4 }
  0x48   : > { %s338_s5 = scalar_lea.vmem (!%p1626_p4), [#allocation3], %s1650_s0 }
  0x4a   : > { %1318 = dma.done.wait (%p1601_p5), %s335_s1, 256  }
  0x4b   : > { %1320 = vsyncadd (%p1601_p5), %s335_s1, 4294967040 }
  0x4c   : > { %1322 = dma.done.wait (%p57_p0), [#allocation7], 512  }
  0x4d   : > { %1324 = vsyncadd (%p57_p0), [#allocation7], 4294966784  ;;  %s351_s7 = sand.u32 1, %s1351_s28  }
  0x4e   : > { %s914_s26 = sshll.u32 %s351_s7, 7 }
  0x4f   : > { %s1662_s9 = scalar_lea.vmem [#allocation8], %s914_s26 }
  0x50   : > { %1326 = dma.done.wait (%p1607_p6), %s335_s1, 2112  }
  0x51   : > { %1328 = vsyncadd (%p1607_p6), %s335_s1, 4294965184  ;;  %s1668_s13 = sshll.u32 %s351_s7, 2  ;;  %s402_s23 = sand.u32 1, %s1339_s25  }
  0x52   : > { %s916_s3 = sshll.u32 %s402_s23, 6  ;;  %s363_s2 = scalar_lea.vmem [#allocation9], %s1668_s13 }
  0x53   : > { %s1674_s15 = scalar_lea.vmem [#allocation10], %s916_s3  ;;  %p917_p13 = scmp.ne.s32.totalorder %s1371_s10, 0 }
  0x54   : > { %s1860_s21 = sld [smem:[#allocation26_spill]] (!%p917_p13) }
  0x55   : > { %413 = sbr.rel (%p917_p13) target bundleno = 554 (0x22a), region = 68  ;;  %s1861_s30 = sld [smem:[#allocation27_spill]] (!%p917_p13) }
  0x56   : > { %s1862_s4 = sld [smem:[#allocation28_spill]] (!%p917_p13) }
  0x5a   : > { %v419_v0 = vld [vmem:[#allocation6 + $0x18] sm:$0xff]  ;;  %v418_v1 = vld [vmem:[#allocation6 + $0x10] sm:$0xff]  ;;  %v417_v2 = vld [vmem:[#allocation6 + $0x8] sm:$0xff]  ;;  %vm424_vm0 = vcmask 261120  }
  0x5b   : > { %443 = vmatpush.msra.mxu0 %v419_v0  ;;  %940 = vmatpush.msra.mxu1 %v419_v0  ;;  %v416_v3 = vld [vmem:[#allocation6] sm:$0xff]  ;;  %v415_v5 = vld [vmem:[%s338_s5 + $0x8] sm:$0xff]  ;;  %v1100_v6 = vld [vmem:[%s1860_s21] ss:$0 sm:$0xff] }
  0x5c   : > { %v414_v4 = vld [vmem:[%s338_s5] sm:$0xff] }
  0x5d   : > { %444 = vmatpush.msra.mxu0 %v418_v1  ;;  %941 = vmatpush.msra.mxu1 %v418_v1 }
  0x5f   : > { %445 = vmatpush.msra.mxu0 %v417_v2  ;;  %942 = vmatpush.msra.mxu1 %v417_v2 }
  0x61   : > { %446 = vmatpush.msra.mxu0 %v416_v3  ;;  %943 = vmatpush.msra.mxu1 %v416_v3 }
  0x62   : > { %918 = vmatmul.msk.f32.vlgmr.msra.gmra.mxu0 %vm424_vm0, %v414_v4  ;;  %919 = vmatmul.msk.f32.vlgmr.msra.gmra.mxu1 %vm424_vm0, %v415_v5 }
  0xdf   : > { %v448_v7 = vpop.f32.mrf.mxu0  ;;  %v451_v8 = vpop.f32.mrf.mxu1 }
  0xe0   : > { %v1682_v9 = vadd.f32 %v1100_v6, %v448_v7  ;;  %v1684_v10 = vadd.f32 %v1100_v6, %v451_v8 }
  0xe2   : > { %v1687_v11 = vmul.f32 0.70710677, %v1682_v9  ;;  %v1690_v12 = vmul.f32 0.70710677, %v1684_v10 }
  0xe4   : > { %v458_v13 = vmul.f32 %v1687_v11, %v1687_v11  ;;  %v498_v14 = vmul.f32 %v1690_v12, %v1690_v12 }
  0xe6   : > { %v459_v15 = vmin.f32 %v458_v13, 16.0  ;;  %v499_v16 = vmin.f32 %v498_v14, 16.0 }
  0xe8   : > { %v460_v17 = vmul.f32 2.1237322e-06, %v459_v15  ;;  %v500_v18 = vmul.f32 2.1237322e-06, %v499_v16  ;;  %v471_v19 = vmul.f32 3.8918573e-05, %v459_v15 }
  0xe9   : > { %v511_v20 = vmul.f32 3.8918573e-05, %v499_v16 }
  0xea   : > { %v461_v21 = vadd.f32 0.00028619796, %v460_v17  ;;  %v501_v22 = vadd.f32 0.00028619796, %v500_v18  ;;  %v472_v23 = vadd.f32 0.001143296, %v471_v19 }
  0xeb   : > { %v512_v24 = vadd.f32 0.001143296, %v511_v20 }
  0xec   : > { %v462_v25 = vmul.f32 %v461_v21, %v459_v15  ;;  %v502_v26 = vmul.f32 %v501_v22, %v499_v16  ;;  %v473_v27 = vmul.f32 %v472_v23, %v459_v15  ;;  %v454_v22 = vmul.f32 0.5, %v1682_v9 }
  0xed   : > { %v513_v28 = vmul.f32 %v512_v24, %v499_v16 }
  0xee   : > { %v463_v29 = vadd.f32 0.0036580483, %v462_v25  ;;  %v474_v30 = vadd.f32 0.014752088, %v473_v27  ;;  %v503_v32 = vadd.f32 0.0036580483, %v502_v26 }
  0xef   : > { %v514_v31 = vadd.f32 0.014752088, %v513_v28  ;;  %v455_v27 = vmul.f32 0.5, %v1684_v10 }
  0xf0   : > { %v475_v33 = vmul.f32 %v474_v30, %v459_v15  ;;  %v464_v35 = vmul.f32 %v463_v29, %v459_v15  ;;  %v504_v38 = vmul.f32 %v503_v32, %v499_v16  ;;  %v1395_v29 = vmov 32.0  }
  0xf1   : > { %v515_v34 = vmul.f32 %v514_v31, %v499_v16 }
  0xf2   : > { %v476_v36 = vadd.f32 0.112945676, %v475_v33  ;;  %v465_v41 = vadd.f32 0.05243302, %v464_v35  ;;  %v505_v44 = vadd.f32 0.05243302, %v504_v38 }
  0xf3   : > { %v516_v37 = vadd.f32 0.112945676, %v515_v34 }
  0xf4   : > { %v477_v39 = vmul.f32 %v476_v36, %v459_v15  ;;  %v466_v47 = vmul.f32 %v465_v41, %v459_v15  ;;  %v506_v50 = vmul.f32 %v505_v44, %v499_v16 }
  0xf5   : > { %v517_v40 = vmul.f32 %v516_v37, %v499_v16 }
  0xf6   : > { %v478_v42 = vadd.f32 0.4994258, %v477_v39  ;;  %v467_v51 = vadd.f32 0.18741608, %v466_v47  ;;  %v507_v52 = vadd.f32 0.18741608, %v506_v50 }
  0xf7   : > { %v518_v43 = vadd.f32 0.4994258, %v517_v40 }
  0xf8   : > { %v479_v45 = vmul.f32 %v478_v42, %v459_v15  ;;  %v468_v54 = vmul.f32 %v467_v51, %v459_v15  ;;  %v508_v57 = vmul.f32 %v507_v52, %v499_v16 }
  0xf9   : > { %v519_v46 = vmul.f32 %v518_v43, %v499_v16 }
  0xfa   : > { %v480_v48 = vadd.f32 1.0, %v479_v45  ;;  %v469_v60 = vadd.f32 1.1283791, %v468_v54  ;;  %v509_v2 = vadd.f32 1.1283791, %v508_v57 }
  0xfb   : > { %v520_v49 = vadd.f32 1.0, %v519_v46 }
  0xfc   : > { %1103 = vrcp.f32 %v480_v48  ;;  %v492_v61 = vand.u32 2147483648, %v480_v48  ;;  %v490_v0 = vand.u32 2147483647, %v480_v48  ;;  %vm486_vm3 = vweird.f32 %v480_v48 }
  0xfd   : > { %1105 = vrcp.f32 %v520_v49  ;;  %v532_v1 = vand.u32 2147483648, %v520_v49  ;;  %v530_v4 = vand.u32 2147483647, %v520_v49  ;;  %vm526_vm5 = vweird.f32 %v520_v49 }
  0xfe   : > { %v493_v6 = vor.u32 1.1754944e-38, %v492_v61  ;;  %v470_v8 = vmul.f32 %v469_v60, %v1687_v11  ;;  %vm491_vm6 = vcmp.eq.f32.partialorder %v490_v0, 8.507059e+37  ;;  %v510_v15 = vmul.f32 %v509_v2, %v1690_v12  ;;  %v1102_v61 = vld [vmem:[%s1862_s4] ss:$0 sm:$0xff] }
  0xff   : > { %v533_v14 = vor.u32 1.1754944e-38, %v532_v1  ;;  %vm531_vm8 = vcmp.eq.f32.partialorder %v530_v4, 8.507059e+37  ;;  %1107 = vrcp.f32 %v1395_v29 }
 0x102   : > { %v1104_v53 = vpop.eup %1103 }
 0x103   : > { %v1106_v55 = vpop.eup %1105  ;;  %v482_v56 = vmul.f32 %v1104_v53, %v480_v48  ;;  %vm487_vm1 = vweird.f32 %v1104_v53 }
 0x104   : > { %v522_v58 = vmul.f32 %v1106_v55, %v520_v49  ;;  %vm527_vm2 = vweird.f32 %v1106_v55  ;;  %vm488_vm4 = vmor %vm486_vm3, %vm487_vm1 }
 0x105   : > { %v483_v59 = vsub.f32 1.0, %v482_v56  ;;  %vm528_vm7 = vmor %vm526_vm5, %vm527_vm2  ;;  %v1108_v30 = vpop.eup %1107 }
 0x106   : > { %v523_v62 = vsub.f32 1.0, %v522_v58  ;;  %v551_v31 = vmul.f32 32.0, %v1108_v30  ;;  %vm555_vm9 = vweird.f32 %v1108_v30  ;;  %v1101_v58 = vld [vmem:[%s1861_s30] ss:$0 sm:$0xff] }
 0x107   : > { %v484_v63 = vmul.f32 %v1104_v53, %v483_v59 }
 0x108   : > { %v524_v3 = vmul.f32 %v1106_v55, %v523_v62  ;;  %v552_v32 = vsub.f32 1.0, %v551_v31 }
 0x109   : > { %v485_v5 = vadd.f32 %v1104_v53, %v484_v63 }
 0x10a   : > { %v525_v7 = vadd.f32 %v1106_v55, %v524_v3  ;;  %v553_v33 = vmul.f32 %v1108_v30, %v552_v32 }
 0x10b   : > { %v489_v13 = vsel %vm488_vm4, %v1104_v53, %v485_v5 }
 0x10c   : > { %v494_v16 = vsel %vm491_vm6, %v493_v6, %v489_v13  ;;  %v529_v17 = vsel %vm528_vm7, %v1106_v55, %v525_v7  ;;  %v554_v9 = vadd.f32 %v1108_v30, %v553_v33 }
 0x10d   : > { %v495_v18 = vmul.f32 %v494_v16, %v470_v8  ;;  %v534_v19 = vsel %vm531_vm8, %v533_v14, %v529_v17 }
 0x10e   : > { %v535_v20 = vmul.f32 %v534_v19, %v510_v15  ;;  %v556_v34 = vsel %vm555_vm9, %v1108_v30, %v554_v9 }
 0x10f   : > { %v920_v21 = vclamps-f32 %v495_v18, 1.0 }
 0x110   : > { %v921_v24 = vclamps-f32 %v535_v20, 1.0 }
 0x111   : > { %v538_v23 = vadd.f32 1.0, %v920_v21 }
 0x112   : > { %v539_v26 = vadd.f32 1.0, %v921_v24 }
 0x113   : > { %v540_v25 = vmul.f32 %v538_v23, %v454_v22 }
 0x114   : > { %v541_v28 = vmul.f32 %v539_v26, %v455_v27 }
 0x115   : > { %v544_v11 = vsel %vm424_vm0, %v540_v25, 0.0 }
 0x116   : > { %545 = vadd.xlane.f32.xlu0 %v544_v11  ;;  %v547_v12 = vsel %vm424_vm0, %v541_v28, 0.0 }
 0x11e   : > { %548 = vadd.xlane.f32.xlu0 %v547_v12 }
 0x189   : > { %v546_v35 = vpop.xlane.xlu0 %545 }
 0x18a   : > { %v557_v36 = vmul.f32 %v556_v34, %v546_v35 }
 0x18c   : > { %v559_v37 = vsub.f32 %v540_v25, %v557_v36 }
 0x18e   : > { %v561_v38 = vmul.f32 %v559_v37, %v559_v37 }
 0x190   : > { %v563_v39 = vsel %vm424_vm0, %v561_v38, 0.0 }
 0x191   : > { %564 = vadd.xlane.f32.xlu1 %v563_v39  ;;  %v549_v10 = vpop.xlane.xlu0 %548 }
 0x192   : > { %v558_v40 = vmul.f32 %v556_v34, %v549_v10 }
 0x194   : > { %v560_v41 = vsub.f32 %v541_v28, %v558_v40 }
 0x196   : > { %v562_v42 = vmul.f32 %v560_v41, %v560_v41 }
 0x198   : > { %v566_v43 = vsel %vm424_vm0, %v562_v42, 0.0 }
 0x199   : > { %567 = vadd.xlane.f32.xlu1 %v566_v43 }
 0x204   : > { %v565_v44 = vpop.xlane.xlu1 %564 }
 0x205   : > { %v569_v45 = vmul.f32 %v565_v44, %v556_v34 }
 0x207   : > { %v571_v46 = vadd.f32 1e-12, %v569_v45 }
 0x209   : > { %1109 = vrsqrt.f32 %v571_v46  ;;  %vm579_vm11 = vweird.f32 %v571_v46 }
 0x20c   : > { %v568_v47 = vpop.xlane.xlu1 %567 }
 0x20d   : > { %v570_v48 = vmul.f32 %v568_v47, %v556_v34 }
 0x20f   : > { %v1110_v49 = vpop.eup %1109  ;;  %v572_v50 = vadd.f32 1e-12, %v570_v48 }
 0x210   : > { %v574_v51 = vmul.f32 %v1110_v49, %v571_v46  ;;  %vm580_vm10 = vweird.f32 %v1110_v49 }
 0x211   : > { %1111 = vrsqrt.f32 %v572_v50  ;;  %vm581_vm12 = vmor %vm579_vm11, %vm580_vm10  ;;  %vm589_vm14 = vweird.f32 %v572_v50 }
 0x212   : > { %v575_v52 = vmul.f32 %v1110_v49, %v574_v51 }
 0x214   : > { %v576_v53 = vmul.f32 0.5, %v575_v52 }
 0x216   : > { %v577_v54 = vsub.f32 1.5, %v576_v53 }
 0x217   : > { %v1112_v55 = vpop.eup %1111 }
 0x218   : > { %v578_v56 = vmul.f32 %v1110_v49, %v577_v54  ;;  %v584_v57 = vmul.f32 %v1112_v55, %v572_v50  ;;  %vm590_vm13 = vweird.f32 %v1112_v55 }
 0x219   : > { %vm591_vm15 = vmor %vm589_vm14, %vm590_vm13 }
 0x21a   : > { %v582_v59 = vsel %vm581_vm12, %v1110_v49, %v578_v56  ;;  %v585_v60 = vmul.f32 %v1112_v55, %v584_v57 }
 0x21b   : > { %v593_v62 = vmul.f32 %v582_v59, %v559_v37 }
 0x21c   : > { %v586_v63 = vmul.f32 0.5, %v585_v60 }
 0x21d   : > { %v598_v0 = vmul.f32 %v1101_v58, %v593_v62 }
 0x21e   : > { %v587_v1 = vsub.f32 1.5, %v586_v63 }
 0x21f   : > { %v603_v2 = vadd.f32 %v1102_v61, %v598_v0 }
 0x220   : > { %v588_v3 = vmul.f32 %v1112_v55, %v587_v1 }
 0x221   : > { %605 = vst.msk [vmem:[#allocation2] sm:$0xff] %vm424_vm0, %v603_v2 }
 0x222   : > { %v592_v4 = vsel %vm591_vm15, %v1112_v55, %v588_v3 }
 0x223   : > { %v594_v5 = vmul.f32 %v592_v4, %v560_v41 }
 0x225   : > { %v599_v6 = vmul.f32 %v1101_v58, %v594_v5 }
 0x227   : > { %v604_v7 = vadd.f32 %v1102_v61, %v599_v6 }
 0x229   : > { %606 = vst.msk [vmem:[#allocation2 + $0x8] sm:$0xff] %vm424_vm0, %v604_v7 }
 0x22a PF: > { %v623_v8 = vld [vmem:[%s1662_s9 + $0x70] sm:$0xff]  ;;  %v624_v13 = vld [vmem:[%s1662_s9 + $0x78] sm:$0xff]  ;;  %v621_v18 = vld [vmem:[%s1662_s9 + $0x60] sm:$0xff]  ;;  %vm635_vm0 = vcmask 261120   ;;  %s1863_s0 = sld [smem:[#allocation17_spill]]  ;;  %s932_s1 = sshll.u32 %s1371_s10, 2 }
 0x22b   : > { %v619_v14 = vld [vmem:[%s1662_s9 + $0x50] sm:$0xff]  ;;  %700 = vmatpush.msra.mxu2 %v623_v8  ;;  %723 = vmatpush.msra.mxu3 %v624_v13  ;;  %v620_v15 = vld [vmem:[%s1662_s9 + $0x58] sm:$0xff]  ;;  %v622_v19 = vld [vmem:[%s1662_s9 + $0x68] sm:$0xff]  ;;  %s1864_s13 = sld [smem:[#allocation30_spill]]  ;;  %s758_s17 = sshll.u32 %s1674_s15, 4  ;;  %s759_s17 = int_to_ptr.vmem [resolvable:$true] %s758_s17 }
 0x22c   : > { %v615_v16 = vld [vmem:[%s1662_s9 + $0x30] sm:$0xff]  ;;  %v616_v17 = vld [vmem:[%s1662_s9 + $0x38] sm:$0xff]  ;;  %v617_v20 = vld [vmem:[%s1662_s9 + $0x40] sm:$0xff]  ;;  %654 = vmatpush.msra.mxu0 %v621_v18  ;;  %677 = vmatpush.msra.mxu1 %v622_v19  ;;  %s743_s21 = scalar_lea.sflag [#allocation5], %s402_s23 }
 0x22d   : > { %701 = vmatpush.msra.mxu2 %v619_v14  ;;  %724 = vmatpush.msra.mxu3 %v620_v15  ;;  %v611_v21 = vld [vmem:[%s1662_s9 + $0x10] sm:$0xff]  ;;  %v612_v22 = vld [vmem:[%s1662_s9 + $0x18] sm:$0xff]  ;;  %v618_v23 = vld [vmem:[%s1662_s9 + $0x48] sm:$0xff] }
 0x22e   : > { %v607_v24 = vld [vmem:[#allocation2] sm:$0xff]  ;;  %655 = vmatpush.msra.mxu0 %v617_v20  ;;  %678 = vmatpush.msra.mxu1 %v618_v23  ;;  %v613_v25 = vld [vmem:[%s1662_s9 + $0x20] sm:$0xff]  ;;  %v614_v11 = vld [vmem:[%s1662_s9 + $0x28] sm:$0xff] }
 0x22f   : > { %702 = vmatpush.msra.mxu2 %v615_v16  ;;  %725 = vmatpush.msra.mxu3 %v616_v17  ;;  %v609_v26 = vld [vmem:[%s1662_s9] sm:$0xff]  ;;  %v610_v27 = vld [vmem:[%s1662_s9 + $0x8] sm:$0xff] }
 0x230   : > { %656 = vmatpush.msra.mxu0 %v613_v25  ;;  %679 = vmatpush.msra.mxu1 %v614_v11  ;;  %v608_v28 = vld [vmem:[#allocation2 + $0x8] sm:$0xff]  ;;  %v625_v12 = vld [vmem:[%s363_s2] sm:$0xf]  ;;  %s939_s5 = sshll.u32 %s1863_s0, 4 }
 0x231   : > { %703 = vmatpush.msra.mxu2 %v611_v21  ;;  %726 = vmatpush.msra.mxu3 %v612_v22  ;;  %v627_v29 = vperm.slane %v625_v12, 0  ;;  %v628_v30 = vperm.slane %v625_v12, 1  ;;  %v629_v31 = vperm.slane %v625_v12, 2  ;;  %v630_v32 = vperm.slane %v625_v12, 3  ;;  %s755_s7 = sadd.s32 %s939_s5, %s932_s1  ;;  %s1865_s3 = smov %s1864_s13 }
 0x232   : > { %926 = vmatmul.msk.f32.vlgmr.msra.gmra.mxu2 %vm635_vm0, %v607_v24  ;;  %928 = vmatmul.msk.f32.vlgmr.msra.gmra.mxu3 %vm635_vm0, %v607_v24  ;;  %s934_s26 = sshll.u32 %s755_s7, 3  ;;  %s1253_s11 = scalar_lea.hbm %s1865_s3, 256 }
 0x233   : > { %657 = vmatpush.msra.mxu0 %v609_v26  ;;  %680 = vmatpush.msra.mxu1 %v610_v27  ;;  %s757_s2 = scalar_lea.hbm %s1864_s13, %s934_s26 }
 0x234   : > { %922 = vmatmul.msk.f32.vlgmr.msra.gmra.mxu0 %vm635_vm0, %v607_v24  ;;  %924 = vmatmul.msk.f32.vlgmr.msra.gmra.mxu1 %vm635_vm0, %v607_v24  ;;  %s760_s20 = sshll.u32 %s757_s2, 4  ;;  %s761_s20 = int_to_ptr.hbm [resolvable:$true] %s760_s20 }
 0x235   : > { %s1247_s16 = sshra.s32 %s761_s20, 4  ;;  %s1248_s16 = int_to_ptr.hbm [resolvable:$true] %s1247_s16 }
 0x236   : > { %s1249_s19 = scalar_lea.hbm %s1248_s16, 64  ;;  %p1254_p6 = scmp.lt.s32.totalorder %s1248_s16, %s1865_s3 }
 0x237   : > { %p1250_p0 = scmp.ne.s32.totalorder %s1248_s16, %s1249_s19  ;;  %p1255_p8 = scmp.lt.s32.totalorder %s1253_s11, %s1249_s19 }
 0x239   : > { %p1251_p3 = pnand %p1250_p0, %p1611_p7  ;;  %p1256_p9 = por %p1255_p8, %p1254_p6 }
 0x23a   : > { %927 = vmatmul.msk.f32.gmra.mxu2 %vm635_vm0, %v608_v28  ;;  %929 = vmatmul.msk.f32.gmra.mxu3 %vm635_vm0, %v608_v28 }
 0x23b   : > { %p1252_p5 = pneg %p1251_p3 }
 0x23c   : > { %923 = vmatmul.msk.f32.gmra.mxu0 %vm635_vm0, %v608_v28  ;;  %925 = vmatmul.msk.f32.gmra.mxu1 %vm635_vm0, %v608_v28 }
 0x23d   : > { %p1257_p10 = pnand %p1256_p9, %p1252_p5 }
 0x2b1   : > { %v659_v33 = vpop.f32.mrf.mxu0  ;;  %v682_v9 = vpop.f32.mrf.mxu1 }
 0x2b2   : > { %v660_v34 = vadd.f32 %v659_v33, %v627_v29  ;;  %v683_v35 = vadd.f32 %v682_v9, %v628_v30 }
 0x2b4   : > { %734 = vst [vmem:[%s1674_s15] sm:$0xff] %v660_v34 }
 0x2b5   : > { %v705_v36 = vpop.f32.mrf.mxu2  ;;  %v728_v37 = vpop.f32.mrf.mxu3  ;;  %735 = vst [vmem:[%s1674_s15 + $0x8] sm:$0xff] %v683_v35 }
 0x2b6   : > { %v706_v38 = vadd.f32 %v705_v36, %v629_v31  ;;  %v729_v39 = vadd.f32 %v728_v37, %v630_v32 }
 0x2b8   : > { %736 = vst [vmem:[%s1674_s15 + $0x10] sm:$0xff] %v706_v38 }
 0x2b9   : > { %737 = vst [vmem:[%s1674_s15 + $0x18] sm:$0xff] %v729_v39  ;;  %v662_v10 = vpop.f32.mrf.mxu0  ;;  %v685_v40 = vpop.f32.mrf.mxu1 }
 0x2ba   : > { %v663_v41 = vadd.f32 %v662_v10, %v627_v29  ;;  %v686_v42 = vadd.f32 %v685_v40, %v628_v30 }
 0x2bc   : > { %738 = vst [vmem:[%s1674_s15 + $0x20] sm:$0xff] %v663_v41 }
 0x2bd   : > { %v708_v43 = vpop.f32.mrf.mxu2  ;;  %v731_v44 = vpop.f32.mrf.mxu3  ;;  %739 = vst [vmem:[%s1674_s15 + $0x28] sm:$0xff] %v686_v42 }
 0x2be   : > { %v709_v45 = vadd.f32 %v708_v43, %v629_v31  ;;  %v732_v46 = vadd.f32 %v731_v44, %v630_v32 }
 0x2c0   : > { %740 = vst [vmem:[%s1674_s15 + $0x30] sm:$0xff] %v709_v45 }
 0x2c1   : > { %741 = vst [vmem:[%s1674_s15 + $0x38] sm:$0xff] %v732_v46 }
 0x2c2   : > { %1260 = shalt.err (!%p1257_p10)
}
 0x2c3   : > { %s1396_s23 = smov 512   ;;  %s1397_s15 = smov 1024  }
 0x2c4   : > { %s1398_s1 = smov 32  }
 0x2c5   : > { %954 = dma.vmem_to_hbm [thread:$0]  (%p1611_p7), %s759_s17, 1024, %s761_s20, %s743_s21, %s1396_s23, %s1397_s15, %s1398_s1  }
 0x2c6 PF: > { %p977_p11 = scmp.ge.s32.totalorder %s1387_s14, 2  ;;  %s775_s5 = sand.u32 1, %s1335_s24  }
 0x2c7   : > { %s776_s7 = scalar_lea.sflag [#allocation5], %s775_s5 }
 0x2c8   : > { %p971_p4 = pnand %p977_p11, %p1619_p12 }
 0x2ca   : > { %p972_p1 = pneg %p971_p4 }
 0x2cc   : > { %1330 = dma.done.wait (%p972_p1), %s776_s7, 1024  }
 0x2cd   : > { %1332 = vsyncadd (%p972_p1), %s776_s7, 4294966272  ;;  %s24_s14 = sadd.s32 1, %s1387_s14   ;;  %s1867_s22 = sld [smem:[#allocation15_spill]] }
 0x2ce   : > { %p1769_p2 = scmp.ge.s32.totalorder %s24_s14, 6   ;;  %s1868_s10 = sld [smem:[#allocation22_spill]] }
 0x2cf   : > { %s1869_s9 = sld [smem:[#allocation23_spill]]  ;;  %s1876_s24 = smov %s1339_s25 }
 0x2d0   : > { %s1870_s13 = sld [smem:[#allocation16_spill]]  ;;  %s1879_s27 = smov %s1351_s28 }
 0x2d1   : > { %s1871_s2 = sld [smem:[#allocation21_spill]]  ;;  %s1880_s28 = smov %s1355_s29 }
 0x2d2   : > { %s1872_s11 = sld [smem:[#allocation18_spill]]  ;;  %s1882_s30 = smov %s1363_s8 }
 0x2d3   : > { %s1873_s17 = sld [smem:[#allocation19_spill]]  ;;  %s1877_s25 = smov %s1867_s22 }
 0x2d4   : > { %s1874_s20 = sld [smem:[#allocation20_spill]]  ;;  %s1878_s26 = smov %s1868_s10 }
 0x2d5   : > { %s1881_s29 = smov %s1869_s9  ;;  %s1885_s10 = smov %s1379_s12 }
 0x2d6   : > { %s1883_s8 = smov %s1870_s13  ;;  %23 = sbr.rel (!%p1769_p2) target bundleno = 19 (0x13), region = 123 }
 0x2d7   : > { %s1884_s9 = smov %s1871_s2 }
 0x2d9   : > { %s1886_s12 = smov %s1873_s17 }
 0x2da   : > { %s1887_s13 = smov %s1874_s20 }
 0x2db   :  { %782 = vsyncpa [#allocation4], 1 }
 0x2dc   :  { %784 = vsyncpa [#allocation4 + $0x1], 1 }
 0x2dd   :  { %785 = vsyncpa [#allocation7], 1 }
 0x2de   :  { %786 = vsyncpa [#allocation5], 1 }
 0x2df   :  { %788 = vsyncpa [#allocation5 + $0x1], 1 }

</bundles_post_ra>
